<compile_context>
chip_gen: v6e
topology: v6e:2x2x1
jax: 0.10.0
libtpu: 0.0.40
codegen_flags: <defaults>
</compile_context>

<pallas_src>
import numpy as np
import jax
import jax.numpy as jnp
from jax.experimental import pallas as pl
from jax.experimental.pallas import tpu as pltpu


# ----------------------------- Pallas kernel --------------------------------

def _deconv_bn_relu_kernel(g_ref, w_ref, scale_ref, shift_ref, o_ref):
    """One (point-tile i, cout-tile j) grid step.

    g_ref:     (TN, K*Cin)  bf16 gathered neighbor features (K folded in)
    w_ref:     (K*Cin, TC)  bf16 conv weights (VMEM-resident across i)
    scale_ref: (1, TC)      f32 BN scale  = gamma / sqrt(var + eps)
    shift_ref: (1, TC)      f32 BN shift  = beta - mean * scale
    o_ref:     (TN, TC)     bf16 output tile (lane-dense, unmasked stores)
    """
    y = jnp.dot(g_ref[...], w_ref[...], preferred_element_type=jnp.float32)
    y = y * scale_ref[...] + shift_ref[...]          # eval-mode BN in f32
    o_ref[...] = jnp.maximum(y, 0.0).astype(o_ref.dtype)


def basic_deconvolution_block(gathered, weight, scale, shift, *, tile_n=512):
    """Fused transposed-sparse-conv matmul + BN + ReLU.

    gathered: (N, K*Cin) bf16 — mirrored kernel-map gather, K folded into the
              contraction (layout [n, k*Cin + c]).
    weight:   (K, Cin, Cout) f32 conv weights.
    scale/shift: (1, Cout) f32 eval-mode BN affine terms.

    Returns (N, round_up(Cout, lane)) bf16.  Channels beyond Cout are zero
    padding; they are kept so stores are lane-dense and a downstream layer can
    consume the padded buffer without an extra HBM pass.
    """
    N, kcin = gathered.shape
    K, Cin, Cout = weight.shape
    assert kcin == K * Cin
    if gathered.dtype != jnp.bfloat16:
        gathered = gathered.astype(jnp.bfloat16)

    # Output-channel tiling: 256-wide tiles for big Cout (v6e/v7x MXU width),
    # otherwise a single 128-lane panel.
    tile_cout = 256 if Cout > 128 else 128
    cout_p = ((Cout + tile_cout - 1) // tile_cout) * tile_cout

    # Clamp tile_n for tiny inputs; keep it a multiple of 16 (bf16 sublane
    # packing granule).
    tile_n = max(16, min(tile_n, ((N + 15) // 16) * 16))

    # Weights stay UNSCALED bf16 (BN scale applied in f32 epilogue); lane-pad
    # the output-channel axis.  These are tiny (KB-MB) one-time ops.
    w2 = jnp.pad(weight.reshape(kcin, Cout).astype(jnp.bfloat16),
                 ((0, 0), (0, cout_p - Cout)))
    scale_p = jnp.pad(scale.astype(jnp.float32), ((0, 0), (0, cout_p - Cout)))
    shift_p = jnp.pad(shift.astype(jnp.float32), ((0, 0), (0, cout_p - Cout)))

    grid = (pl.cdiv(N, tile_n), cout_p // tile_cout)

    # Explicit VMEM budget (double-buffered gathered/weight/output tiles plus
    # scale/shift), 2x headroom, floored at 16 MiB, capped at v7x's 64 MiB.
    tile_bytes = 2 * (tile_n * kcin * 2        # gathered tile (bf16)
                      + kcin * tile_cout * 2   # weight panel (bf16)
                      + tile_n * tile_cout * 2 # output tile (bf16)
                      + 2 * tile_cout * 4)     # scale + shift (f32)
    vmem_limit = int(min(max(2 * tile_bytes, 16 * 1024 * 1024),
                         64 * 1024 * 1024))

    out = pl.pallas_call(
        _deconv_bn_relu_kernel,
        out_shape=jax.ShapeDtypeStruct((N, cout_p), jnp.bfloat16),
        grid_spec=pltpu.PrefetchScalarGridSpec(
            num_scalar_prefetch=0,
            grid=grid,
            in_specs=[
                # Gathered features: one (tile_n, K*Cin) block per i; constant
                # across j so it is fetched once per point tile.
                pl.BlockSpec((tile_n, kcin), lambda i, j: (i, 0)),
                # Weights: constant across i -> VMEM-resident per cout tile.
                pl.BlockSpec((kcin, tile_cout), lambda i, j: (0, j)),
                # BN scale / shift: tiny, resident.
                pl.BlockSpec((1, tile_cout), lambda i, j: (0, j)),
                pl.BlockSpec((1, tile_cout), lambda i, j: (0, j)),
            ],
            out_specs=pl.BlockSpec((tile_n, tile_cout), lambda i, j: (i, j)),
        ),
        compiler_params=pltpu.CompilerParams(
            dimension_semantics=("parallel", "parallel"),
            vmem_limit_bytes=vmem_limit,
        ),
    )(gathered, w2, scale_p, shift_p)

    return out


# ------------------------------ JAX glue -------------------------------------

def build_offsets(ks):
    """Kernel offsets (K, 3) as a static numpy array.
    NOTE: when porting real torchsparse weights the enumeration order must
    match torchsparse's kernel-offset order."""
    r = np.arange(ks) - ks // 2
    dx, dy, dz = np.meshgrid(r, r, r, indexing="ij")
    return np.stack([dx.ravel(), dy.ravel(), dz.ravel()], axis=1).astype(np.int32)


def gather_neighbors(feats_bf, coords, offsets, grid_size):
    """feats_bf: (N, Cin) bf16; coords: (N, 3) int32 in [0, grid_size).

    Returns (N, K*Cin) bf16 where row n, slot k holds the feature of the input
    point at coords[n] - offsets[k] (mirrored map of the transposed conv), or
    zeros if absent.  Produced directly in the kernel's layout/dtype — no
    extra transpose / cast / pad passes over the K-inflated tensor.
    """
    N = coords.shape[0]
    S = grid_size
    keys = coords[:, 0] * (S * S) + coords[:, 1] * S + coords[:, 2]
    order = jnp.argsort(keys)
    sorted_keys = keys[order]

    def per_offset(off):
        nb = coords - off[None, :]                      # mirrored kernel map
        valid = jnp.all((nb >= 0) & (nb < S), axis=1)
        nb_key = nb[:, 0] * (S * S) + nb[:, 1] * S + nb[:, 2]
        pos = jnp.clip(jnp.searchsorted(sorted_keys, nb_key), 0, N - 1)
        found = (sorted_keys[pos] == nb_key) & valid
        idx = jnp.where(found, order[pos], 0)
        return jnp.where(found[:, None], feats_bf[idx], jnp.zeros((), jnp.bfloat16))

    g = jax.vmap(per_offset, out_axes=1)(offsets)       # (N, K, Cin) bf16
    return g.reshape(N, -1)                             # (N, K*Cin) bf16


def dense_transposed_conv_reference(feats, coords, weight, offsets_np, S,
                                    scale, shift):
    """f32 ground truth: scatter to a dense grid, do the transposed (mirrored)
    stride-1 conv, apply eval-mode BN + ReLU, read back at the active coords."""
    Cin = feats.shape[1]
    Cout = weight.shape[-1]
    pad = int(np.max(np.abs(offsets_np)))
    dense = jnp.zeros((S, S, S, Cin), jnp.float32)
    dense = dense.at[coords[:, 0], coords[:, 1], coords[:, 2]].set(feats)
    dense_p = jnp.pad(dense, ((pad, pad), (pad, pad), (pad, pad), (0, 0)))
    out = jnp.zeros((S, S, S, Cout), jnp.float32)
    for k in range(offsets_np.shape[0]):
        dx, dy, dz = (int(v) for v in offsets_np[k])
        # shifted[p] = dense[p - d]  (zeros outside the grid)
        shifted = dense_p[pad - dx: pad - dx + S,
                          pad - dy: pad - dy + S,
                          pad - dz: pad - dz + S, :]
        out = out + jnp.tensordot(shifted, weight[k], axes=([3], [0]))
    out = out * scale.reshape(1, 1, 1, Cout) + shift.reshape(1, 1, 1, Cout)
    out = jnp.maximum(out, 0.0)
    return out[coords[:, 0], coords[:, 1], coords[:, 2]]


# ------------------------------- main ----------------------------------------

if __name__ == "__main__":
    key = jax.random.PRNGKey(0)
    k_coord, k_feat, k_w, k_gamma, k_beta, k_mean, k_var = jax.random.split(key, 7)

    # Small synthetic sparse tensor.
    N = 64          # number of active voxels
    S = 8           # spatial extent of the voxel grid
    inc, outc = 16, 32
    ks = 3
    K = ks ** 3
    eps = 1e-5

    # Unique random voxel coordinates (sample cells without replacement).
    flat = jax.random.choice(k_coord, S * S * S, shape=(N,), replace=False)
    coords = jnp.stack([flat // (S * S), (flat // S) % S, flat % S],
                       axis=1).astype(jnp.int32)

    feats = jax.random.normal(k_feat, (N, inc), dtype=jnp.float32)

    # Parameters (matching torchsparse shapes).
    weight = 0.1 * jax.random.normal(k_w, (K, inc, outc), dtype=jnp.float32)
    gamma = 1.0 + 0.1 * jax.random.normal(k_gamma, (outc,), dtype=jnp.float32)
    beta = 0.1 * jax.random.normal(k_beta, (outc,), dtype=jnp.float32)
    running_mean = 0.1 * jax.random.normal(k_mean, (outc,), dtype=jnp.float32)
    running_var = 1.0 + 0.1 * jax.random.uniform(k_var, (outc,), dtype=jnp.float32)

    scale = (gamma / jnp.sqrt(running_var + eps)).reshape(1, outc)
    shift = (beta - running_mean * scale[0]).reshape(1, outc)

    # Kernel map / neighbor gather (XLA glue; see TODO(synk) at top).
    offsets = build_offsets(ks)                                     # static numpy
    gathered = gather_neighbors(feats.astype(jnp.bfloat16), coords,
                                jnp.asarray(offsets), S)            # (N, K*Cin) bf16

    # Pallas kernel: one deep MXU matmul per (point, cout) tile + f32 BN + ReLU.
    out_padded = basic_deconvolution_block(gathered, weight, scale, shift,
                                           tile_n=512)
    out_padded = jax.block_until_ready(out_padded)

    # A downstream sparse layer would consume the lane-padded bf16 buffer
    # directly; channels are sliced here only for the reference check.
    out = out_padded[:, :outc].astype(jnp.float32)

    ref = dense_transposed_conv_reference(feats, coords, weight, offsets, S,
                                          scale, shift)

    assert out_padded.shape == (N, 128)
    assert out.shape == (N, outc)
    err = float(jnp.max(jnp.abs(out - ref)))
    assert jnp.allclose(out, ref, atol=5e-2, rtol=5e-2), f"max abs err {err}"
    print("KERNEL_OK")
</pallas_src>

<mosaic_0001>
module attributes {stable_mosaic.version = 11 : i64} {
  func.func @_deconv_bn_relu_kernel(%arg0: i32, %arg1: i32, %arg2: memref<64x432xbf16, #tpu.memory_space<vmem>>, %arg3: memref<432x128xbf16, #tpu.memory_space<vmem>>, %arg4: memref<1x128xf32, #tpu.memory_space<vmem>>, %arg5: memref<1x128xf32, #tpu.memory_space<vmem>>, %arg6: memref<64x128xbf16, #tpu.memory_space<vmem>>) attributes {dimension_semantics = [#tpu.dimension_semantics<parallel>, #tpu.dimension_semantics<parallel>], iteration_bounds = array<i64: 1, 1>, scalar_prefetch = 0 : i64, scratch_operands = 0 : i64, tpu.core_type = #tpu.core_type<tc>, window_params = [{transform_indices = @transform_0, window_bounds = array<i64: 64, 432>}, {transform_indices = @transform_1, window_bounds = array<i64: 432, 128>}, {transform_indices = @transform_2, window_bounds = array<i64: 1, 128>}, {transform_indices = @transform_3, window_bounds = array<i64: 1, 128>}, {transform_indices = @transform_4, window_bounds = array<i64: 64, 128>}]} {
    %c0 = arith.constant 0 : index
    %c0_0 = arith.constant 0 : index
    %0 = vector.load %arg2[%c0, %c0_0] : memref<64x432xbf16, #tpu.memory_space<vmem>>, vector<64x432xbf16>
    %c0_1 = arith.constant 0 : index
    %c0_2 = arith.constant 0 : index
    %1 = vector.load %arg3[%c0_1, %c0_2] : memref<432x128xbf16, #tpu.memory_space<vmem>>, vector<432x128xbf16>
    %cst = arith.constant dense<0.000000e+00> : vector<64x128xf32>
    %2 = tpu.matmul %0, %1, %cst {dimension_numbers = #tpu.dot_dimension_numbers<[1], [0], [0], [1], [0, 0, 1, 1], [], []>} : vector<64x432xbf16>, vector<432x128xbf16>, vector<64x128xf32> -> vector<64x128xf32>
    %c0_3 = arith.constant 0 : index
    %c0_4 = arith.constant 0 : index
    %3 = vector.load %arg4[%c0_3, %c0_4] : memref<1x128xf32, #tpu.memory_space<vmem>>, vector<1x128xf32>
    %4 = vector.broadcast %3 : vector<1x128xf32> to vector<64x128xf32>
    %5 = arith.mulf %2, %4 : vector<64x128xf32>
    %c0_5 = arith.constant 0 : index
    %c0_6 = arith.constant 0 : index
    %6 = vector.load %arg5[%c0_5, %c0_6] : memref<1x128xf32, #tpu.memory_space<vmem>>, vector<1x128xf32>
    %7 = vector.broadcast %6 : vector<1x128xf32> to vector<64x128xf32>
    %8 = arith.addf %5, %7 : vector<64x128xf32>
    %cst_7 = arith.constant 0.000000e+00 : f32
    %9 = vector.broadcast %cst_7 : f32 to vector<64x128xf32>
    %10 = arith.maximumf %8, %9 : vector<64x128xf32>
    %11 = arith.truncf %10 : vector<64x128xf32> to vector<64x128xbf16>
    %c0_8 = arith.constant 0 : index
    %c0_9 = arith.constant 0 : index
    %12 = vector.load %arg6[%c0_8, %c0_9] : memref<64x128xbf16, #tpu.memory_space<vmem>>, vector<64x128xbf16>
    tpu.vector_store %arg6[%c0_8, %c0_9], %11 {strides = array<i32>} : memref<64x128xbf16, #tpu.memory_space<vmem>>, vector<64x128xbf16>,
    return
  }
  func.func @transform_0(%arg0: i32, %arg1: i32) -> (i32, i32) {
    %c0_i32 = arith.constant 0 : i32
    %c0_i32_0 = arith.constant 0 : i32
    return %arg0, %c0_i32 : i32, i32
  }
  func.func @transform_1(%arg0: i32, %arg1: i32) -> (i32, i32) {
    %c0_i32 = arith.constant 0 : i32
    %c0_i32_0 = arith.constant 0 : i32
    return %c0_i32, %arg1 : i32, i32
  }
  func.func @transform_2(%arg0: i32, %arg1: i32) -> (i32, i32) {
    %c0_i32 = arith.constant 0 : i32
    %c0_i32_0 = arith.constant 0 : i32
    return %c0_i32, %arg1 : i32, i32
  }
  func.func @transform_3(%arg0: i32, %arg1: i32) -> (i32, i32) {
    %c0_i32 = arith.constant 0 : i32
    %c0_i32_0 = arith.constant 0 : i32
    return %c0_i32, %arg1 : i32, i32
  }
  func.func @transform_4(%arg0: i32, %arg1: i32) -> (i32, i32) {
    %c0_i32 = arith.constant 0 : i32
    return %arg0, %arg1 : i32, i32
  }
}

</mosaic_0001>

<bundles_post_ra>
// kernel: tpu_custom_call.1
= control target key start
LH: loop header
LB: loop body
LE: loop exit
PB: predicated region body
PF: predicated region fallthrough
CT: control target
= control target key end

     0   :  { %9 = vsyncpa [#allocation3], 0  ;;  %s936_s0 = inlined_call_operand.hbm [shape: bf16[64,432], index: 0, kind: input, shape index: {}]   ;;  %s937_s1 = inlined_call_operand.hbm [shape: bf16[432,128], index: 1, kind: input, shape index: {}]   ;;  %s938_s2 = inlined_call_operand.vmem [shape: f32[1,128], index: 2, kind: input, shape index: {}]   ;;  %s939_s3 = inlined_call_operand.vmem [shape: f32[1,128], index: 3, kind: input, shape index: {}]   ;;  %s940_s4 = inlined_call_operand.hbm [shape: bf16[64,128], index: 4, kind: output, shape index: {}]  }
   0x1   :  { %10 = vsyncpa [#allocation6], 0 }
   0x2   :  { %11 = vsyncpa [#allocation4], 0  ;;  %s847_s15 = smov [#allocation2]  }
   0x3   :  { %s17_s16 = sshll.u32 %s847_s15, 4  ;;  %s18_s16 = int_to_ptr.vmem [resolvable:$true] %s17_s16 }
   0x4   :  { %s789_s17 = scalar_lea.vmem %s18_s16, 2048  ;;  %p794_p1 = scmp.lt.s32.totalorder %s18_s16, %s18_s16 }
   0x5   :  { %p790_p0 = scmp.ne.s32.totalorder %s18_s16, %s789_s17  ;;  %p795_p2 = scmp.lt.s32.totalorder %s789_s17, %s789_s17 }
   0x7   :  { %p796_p3 = por %p795_p2, %p794_p1 }
   0x9   :  { %p797_p4 = pnand %p796_p3, %p790_p0 }
   0xb   :  { %800 = shalt.err (!%p797_p4)
}
   0xc   :  { %s848_s18 = smov 256   ;;  %s849_s19 = smov 16  }
   0xd   :  { %23 = dma.hbm_to_vmem [thread:$0]  %s936_s0, 2048, %s18_s16, [#allocation3], %s848_s18, %s848_s18, %s849_s19  }
   0xe   :  { %s850_s22 = smov [#allocation5]  }
   0xf   :  { %s29_s23 = sshll.u32 %s850_s22, 4  ;;  %s30_s23 = int_to_ptr.vmem [resolvable:$true] %s29_s23 }
  0x10   :  { %s809_s24 = scalar_lea.vmem %s30_s23, 3456  ;;  %p814_p6 = scmp.lt.s32.totalorder %s30_s23, %s30_s23 }
  0x11   :  { %p810_p5 = scmp.ne.s32.totalorder %s30_s23, %s809_s24  ;;  %p815_p7 = scmp.lt.s32.totalorder %s809_s24, %s809_s24 }
  0x13   :  { %p816_p8 = por %p815_p7, %p814_p6 }
  0x15   :  { %p817_p9 = pnand %p816_p8, %p810_p5 }
  0x17   :  { %820 = shalt.err (!%p817_p9)
}
  0x18   :  { %s851_s25 = smov 64   ;;  %s852_s26 = smov 4  }
  0x19   :  { %35 = dma.hbm_to_vmem [thread:$0]  %s937_s1, 3456, %s30_s23, [#allocation6], %s851_s25, %s851_s25, %s852_s26  }
  0x1a   :  { %841 = dma.done.wait [#allocation3], 2048  }
  0x1b   :  { %842 = vsyncadd [#allocation3], 4294965248 }
  0x1c   :  { %843 = dma.done.wait [#allocation6], 3456  }
  0x1d   :  { %844 = vsyncadd [#allocation6], 4294963840  ;;  %v853_v0 = vmov 0   ;;  %v730_v1 = vld [vmem:[#allocation5 + $0xb8] sm:$0xff]   ;;  %v733_v4 = vld [vmem:[#allocation5 + $0xb0] sm:$0xff]   ;;  %vm355_vm0 = vcmask 392192  }
  0x1e   :  { %433 = vmatprep.subr.bf16.mxu1 %v853_v0  ;;  %v731_v2 = vld [vmem:[#allocation5 + $0x78] sm:$0xff]   ;;  %v734_v5 = vld [vmem:[#allocation5 + $0x70] sm:$0xff]   ;;  %v736_v7 = vld [vmem:[#allocation5 + $0xa8] sm:$0xff]  }
  0x1f   :  { %434 = vmatpush1.bf16.msra.mxu1 %v730_v1  ;;  %v732_v3 = vld [vmem:[#allocation5 + $0x38] sm:$0xff]   ;;  %682 = vmatprep.subr.bf16.mxu0 %v731_v2  ;;  %v735_v6 = vld [vmem:[#allocation5 + $0x30] sm:$0xff]   ;;  %v737_v8 = vld [vmem:[#allocation5 + $0x68] sm:$0xff]  }
  0x20   :  { %435 = vmatprep.subr.bf16.mxu1 %v853_v0  ;;  %683 = vmatpush3.bf16.msra.mxu0 %v732_v3  ;;  %v738_v9 = vld [vmem:[#allocation5 + $0x28] sm:$0xff]   ;;  %v739_v10 = vld [vmem:[#allocation5 + $0xa0] sm:$0xff]   ;;  %v743_v13 = vld [vmem:[#allocation5 + $0x58] sm:$0xff]  }
  0x21   :  { %684 = vmatprep.subr.bf16.mxu0 %v734_v5  ;;  %v740_v11 = vld [vmem:[#allocation5 + $0x60] sm:$0xff]   ;;  %v742_v14 = vld [vmem:[#allocation5 + $0x98] sm:$0xff]   ;;  %v746_v16 = vld [vmem:[#allocation5 + $0x50] sm:$0xff]  }
  0x22   :  { %v741_v12 = vld [vmem:[#allocation5 + $0x20] sm:$0xff]   ;;  %v744_v15 = vld [vmem:[#allocation5 + $0x18] sm:$0xff]   ;;  %v745_v17 = vld [vmem:[#allocation5 + $0x90] sm:$0xff]  }
  0x23   :  { %436 = vmatpush1.bf16.msra.mxu1 %v733_v4  ;;  %v747_v18 = vld [vmem:[#allocation5 + $0x10] sm:$0xff]   ;;  %v749_v19 = vld [vmem:[#allocation5 + $0x48] sm:$0xff]   ;;  %v752_v22 = vld [vmem:[#allocation5 + $0x40] sm:$0xff]  }
  0x24   :  { %437 = vmatprep.subr.bf16.mxu1 %v853_v0  ;;  %685 = vmatpush3.bf16.msra.mxu0 %v735_v6  ;;  %v748_v20 = vld [vmem:[#allocation5 + $0x88] sm:$0xff]   ;;  %v756_v23 = vld [vmem:[#allocation2 + $0x4] ss:$16 sps:$4 sm:$0xff]   ;;  %v754_v28 = vld [vmem:[#allocation2] ss:$16 sps:$4 sm:$0xff]  }
  0x25   :  { %686 = vmatprep.subr.bf16.mxu0 %v737_v8  ;;  %v750_v21 = vld [vmem:[#allocation5 + $0x8] sm:$0xff]   ;;  %v751_v24 = vld [vmem:[#allocation5 + $0x80] sm:$0xff]   ;;  %400 = vmatprep.mubr.bf16.mxu0 %v756_v23  ;;  %v757_v26 = vld [vmem:[#allocation5 + $0xd0] sm:$0xff]  }
  0x26   :  { %v753_v25 = vld [vmem:[#allocation5] sm:$0xff]   ;;  %v765_v27 = vld [vmem:[#allocation2 + $0xc] ss:$16 sps:$4 sm:$0xff]   ;;  %v763_v34 = vld [vmem:[#allocation2 + $0x8] ss:$16 sps:$4 sm:$0xff]  }
  0x27   :  { %438 = vmatpush1.bf16.msra.mxu1 %v736_v7  ;;  %v759_v29 = vld [vmem:[#allocation2 + $0x24] ss:$16 sps:$4 sm:$0xff]   ;;  %637 = vmatprep.mubr.msk.bf16.mxu1 %vm355_vm0, %v765_v27  ;;  %v758_v30 = vld [vmem:[#allocation5 + $0xc8] sm:$0xff]   ;;  %v762_v32 = vld [vmem:[#allocation2 + $0x20] ss:$16 sps:$4 sm:$0xff]  }
  0x28   :  { %439 = vmatprep.subr.bf16.mxu1 %v853_v0  ;;  %687 = vmatpush3.bf16.msra.mxu0 %v738_v9  ;;  %v761_v31 = vld [vmem:[#allocation5 + $0xc0] sm:$0xff]   ;;  %v769_v35 = vld [vmem:[#allocation2 + $0x2c] ss:$16 sps:$4 sm:$0xff]   ;;  %v771_v38 = vld [vmem:[#allocation2 + $0x28] ss:$16 sps:$4 sm:$0xff]  }
  0x29   :  { %688 = vmatprep.subr.bf16.mxu0 %v740_v11  ;;  %v766_v33 = vld [vmem:[#allocation2 + $0x44] ss:$16 sps:$4 sm:$0xff]   ;;  %v768_v36 = vld [vmem:[#allocation2 + $0x40] ss:$16 sps:$4 sm:$0xff]   ;;  %v775_v39 = vld [vmem:[#allocation2 + $0x4c] ss:$16 sps:$4 sm:$0xff]  }
  0x2a   :  { %v772_v37 = vld [vmem:[#allocation2 + $0x64] ss:$16 sps:$4 sm:$0xff]   ;;  %v774_v40 = vld [vmem:[#allocation2 + $0x60] ss:$16 sps:$4 sm:$0xff]   ;;  %v777_v41 = vld [vmem:[#allocation2 + $0x48] ss:$16 sps:$4 sm:$0xff]  }
  0x2b   :  { %440 = vmatpush1.bf16.msra.mxu1 %v739_v10  ;;  %v778_v42 = vld [vmem:[#allocation2 + $0x6c] ss:$16 sps:$4 sm:$0xff]   ;;  %v780_v43 = vld [vmem:[#allocation2 + $0x68] ss:$16 sps:$4 sm:$0xff]   ;;  %v907_v52 = vld [vmem:[%s938_s2] ss:$0 sm:$0xff] }
  0x2c   :  { %441 = vmatprep.subr.bf16.mxu1 %v853_v0  ;;  %689 = vmatpush3.bf16.msra.mxu0 %v741_v12  ;;  %v913_v58 = vld [vmem:[%s939_s3] ss:$0 sm:$0xff]  ;;  %s854_s2 = smov [#allocation7]  }
  0x2d   :  { %690 = vmatprep.subr.bf16.mxu0 %v743_v13  ;;  %s581_s3 = sshll.u32 %s854_s2, 4  ;;  %s582_s3 = int_to_ptr.vmem [resolvable:$true] %s581_s3 }
  0x2e   :  { %s821_s5 = scalar_lea.vmem %s582_s3, 512  ;;  %p826_p11 = scmp.lt.s32.totalorder %s582_s3, %s582_s3 }
  0x2f   :  { %442 = vmatpush1.bf16.msra.mxu1 %v742_v14  ;;  %p822_p10 = scmp.ne.s32.totalorder %s582_s3, %s821_s5  ;;  %p827_p12 = scmp.lt.s32.totalorder %s821_s5, %s821_s5 }
  0x30   :  { %443 = vmatprep.subr.bf16.mxu1 %v853_v0  ;;  %691 = vmatpush3.bf16.msra.mxu0 %v744_v15 }
  0x31   :  { %692 = vmatprep.subr.bf16.mxu0 %v746_v16  ;;  %p828_p13 = por %p827_p12, %p826_p11 }
  0x33   :  { %444 = vmatpush1.bf16.msra.mxu1 %v745_v17  ;;  %p829_p0 = pnand %p828_p13, %p822_p10 }
  0x34   :  { %445 = vmatprep.subr.bf16.mxu1 %v853_v0  ;;  %693 = vmatpush3.bf16.msra.mxu0 %v747_v18 }
  0x35   :  { %694 = vmatprep.subr.bf16.mxu0 %v749_v19 }
  0x37   :  { %446 = vmatpush1.bf16.msra.mxu1 %v748_v20 }
  0x38   :  { %447 = vmatprep.subr.bf16.mxu1 %v853_v0  ;;  %695 = vmatpush3.bf16.msra.mxu0 %v750_v21 }
  0x39   :  { %696 = vmatprep.subr.bf16.mxu0 %v752_v22 }
  0x3b   :  { %448 = vmatpush1.bf16.msra.mxu1 %v751_v24 }
  0x3c   :  { %459 = vmatprep.subr.bf16.mxu1 %v853_v0  ;;  %697 = vmatpush3.bf16.msra.mxu0 %v753_v25 }
  0x3f   :  { %460 = vmatpush2.bf16.msra.mxu1 %v757_v26  ;;  %401 = vmatmul.mubr.bf16.vlgmr.msra.gmra.mxu0 %v754_v28 }
  0x40   :  { %461 = vmatprep.subr.bf16.mxu1 %v853_v0  ;;  %408 = vmatprep.mubr.bf16.mxu0 %v759_v29 }
  0x43   :  { %462 = vmatpush2.bf16.msra.mxu1 %v758_v30 }
  0x44   :  { %463 = vmatprep.subr.bf16.mxu1 %v853_v0 }
  0x47   :  { %464 = vmatpush2.bf16.msra.mxu1 %v761_v31  ;;  %409 = vmatmul.mubr.bf16.gmra.mxu0 %v762_v32 }
  0x48   :  { %416 = vmatprep.mubr.bf16.mxu0 %v766_v33 }
  0x4a   :  { %466 = vmatmul.mubr.bf16.vlgmr.msra.gmra.mxu1 %v763_v34 }
  0x4b   :  { %638 = vmatprep.mubr.msk.bf16.mxu1 %vm355_vm0, %v769_v35 }
  0x4f   :  { %417 = vmatmul.mubr.bf16.gmra.mxu0 %v768_v36 }
  0x50   :  { %424 = vmatprep.mubr.bf16.mxu0 %v772_v37 }
  0x52   :  { %474 = vmatmul.mubr.bf16.gmra.mxu1 %v771_v38 }
  0x53   :  { %639 = vmatprep.mubr.msk.bf16.mxu1 %vm355_vm0, %v775_v39 }
  0x57   :  { %425 = vmatmul.mubr.bf16.gmra.mxu0 %v774_v40 }
  0x5a   :  { %482 = vmatmul.mubr.bf16.gmra.mxu1 %v777_v41 }
  0x5b   :  { %640 = vmatprep.mubr.msk.bf16.mxu1 %vm355_vm0, %v778_v42 }
  0x62   :  { %490 = vmatmul.mubr.bf16.gmra.mxu1 %v780_v43 }
  0xff   :  { %v698_v44 = vpop.f32.mrf.mxu0 }
 0x101   :  { %v699_v45 = vpop.f32.mrf.mxu0 }
 0x102   :  { %v700_v49 = vadd.f32 %v699_v45, %v698_v44 }
 0x103   :  { %v701_v46 = vpop.f32.mrf.mxu0 }
 0x105   :  { %v702_v47 = vpop.f32.mrf.mxu0 }
 0x106   :  { %v703_v56 = vadd.f32 %v702_v47, %v701_v46 }
 0x107   :  { %v704_v48 = vpop.f32.mrf.mxu0 }
 0x109   :  { %v705_v50 = vpop.f32.mrf.mxu0 }
 0x10a   :  { %v467_v51 = vpop.f32.mrf.mxu1  ;;  %v706_v0 = vadd.f32 %v705_v50, %v704_v48 }
 0x10b   :  { %v468_v53 = vadd.f32 %v700_v49, %v467_v51  ;;  %v707_v54 = vpop.f32.mrf.mxu0 }
 0x10c   :  { %v469_v55 = vpop.f32.mrf.mxu1 }
 0x10d   :  { %v505_v57 = vmul.f32 %v907_v52, %v468_v53  ;;  %v708_v59 = vpop.f32.mrf.mxu0 }
 0x10e   :  { %v470_v60 = vpop.f32.mrf.mxu1  ;;  %v709_v10 = vadd.f32 %v708_v59, %v707_v54 }
 0x10f   :  { %v471_v61 = vadd.f32 %v703_v56, %v470_v60  ;;  %v710_v62 = vpop.f32.mrf.mxu0  ;;  %v520_v1 = vadd.f32 %v913_v58, %v505_v57 }
 0x110   :  { %v472_v63 = vpop.f32.mrf.mxu1 }
 0x111   :  { %v506_v2 = vmul.f32 %v907_v52, %v471_v61  ;;  %v711_v3 = vpop.f32.mrf.mxu0  ;;  %v528_v9 = vmax.f32 %v520_v1, 0.0 }
 0x112   :  { %v475_v4 = vpop.f32.mrf.mxu1  ;;  %v712_v19 = vadd.f32 %v711_v3, %v710_v62 }
 0x113   :  { %v521_v5 = vadd.f32 %v913_v58, %v506_v2  ;;  %v476_v6 = vadd.f32 %v706_v0, %v475_v4  ;;  %v713_v7 = vpop.f32.mrf.mxu0 }
 0x114   :  { %v477_v8 = vpop.f32.mrf.mxu1 }
 0x115   :  { %v529_v11 = vmax.f32 %v521_v5, 0.0  ;;  %v507_v12 = vmul.f32 %v907_v52, %v476_v6  ;;  %v714_v13 = vpop.f32.mrf.mxu0 }
 0x116   :  { %v478_v14 = vpop.f32.mrf.mxu1  ;;  %v715_v28 = vadd.f32 %v714_v13, %v713_v7 }
 0x117   :  { %v662_v15 = vpack.c.bf16 %v529_v11, %v528_v9  ;;  %v479_v16 = vadd.f32 %v709_v10, %v478_v14  ;;  %v716_v17 = vpop.f32.mrf.mxu0  ;;  %v522_v20 = vadd.f32 %v913_v58, %v507_v12 }
 0x118   :  { %v480_v18 = vpop.f32.mrf.mxu1 }
 0x119   :  { %663 = vst [vmem:[#allocation7] sm:$0xff] %v662_v15   ;;  %v508_v21 = vmul.f32 %v907_v52, %v479_v16  ;;  %v717_v22 = vpop.f32.mrf.mxu0  ;;  %v530_v27 = vmax.f32 %v522_v20, 0.0 }
 0x11a   :  { %v483_v23 = vpop.f32.mrf.mxu1  ;;  %v718_v36 = vadd.f32 %v717_v22, %v716_v17 }
 0x11b   :  { %v523_v24 = vadd.f32 %v913_v58, %v508_v21  ;;  %v484_v25 = vadd.f32 %v712_v19, %v483_v23  ;;  %v719_v31 = vpop.f32.mrf.mxu0 }
 0x11c   :  { %v485_v26 = vpop.f32.mrf.mxu1 }
 0x11d   :  { %v531_v29 = vmax.f32 %v523_v24, 0.0  ;;  %v509_v30 = vmul.f32 %v907_v52, %v484_v25  ;;  %v720_v39 = vpop.f32.mrf.mxu0 }
 0x11e   :  { %v486_v32 = vpop.f32.mrf.mxu1  ;;  %v721_v45 = vadd.f32 %v720_v39, %v719_v31 }
 0x11f   :  { %v667_v33 = vpack.c.bf16 %v531_v29, %v530_v27  ;;  %v487_v34 = vadd.f32 %v715_v28, %v486_v32  ;;  %v524_v37 = vadd.f32 %v913_v58, %v509_v30 }
 0x120   :  { %v488_v35 = vpop.f32.mrf.mxu1 }
 0x121   :  { %679 = vst [vmem:[#allocation7 + $0x8] sm:$0xff] %v667_v33   ;;  %v510_v38 = vmul.f32 %v907_v52, %v487_v34  ;;  %v532_v44 = vmax.f32 %v524_v37, 0.0 }
 0x122   :  { %v491_v40 = vpop.f32.mrf.mxu1 }
 0x123   :  { %v525_v41 = vadd.f32 %v913_v58, %v510_v38  ;;  %v492_v42 = vadd.f32 %v718_v36, %v491_v40 }
 0x124   :  { %v493_v43 = vpop.f32.mrf.mxu1 }
 0x125   :  { %v533_v46 = vmax.f32 %v525_v41, 0.0  ;;  %v511_v47 = vmul.f32 %v907_v52, %v492_v42 }
 0x126   :  { %v494_v48 = vpop.f32.mrf.mxu1 }
 0x127   :  { %v672_v49 = vpack.c.bf16 %v533_v46, %v532_v44  ;;  %v495_v50 = vadd.f32 %v721_v45, %v494_v48  ;;  %v526_v53 = vadd.f32 %v913_v58, %v511_v47 }
 0x128   :  { %v496_v51 = vpop.f32.mrf.mxu1 }
 0x129   :  { %680 = vst [vmem:[#allocation7 + $0x10] sm:$0xff] %v672_v49   ;;  %v512_v54 = vmul.f32 %v907_v52, %v495_v50  ;;  %v534_v56 = vmax.f32 %v526_v53, 0.0 }
 0x12b   :  { %v527_v55 = vadd.f32 %v913_v58, %v512_v54 }
 0x12d   :  { %v535_v57 = vmax.f32 %v527_v55, 0.0 }
 0x12f   :  { %v677_v59 = vpack.c.bf16 %v535_v57, %v534_v56 }
 0x131   :  { %681 = vst [vmem:[#allocation7 + $0x18] sm:$0xff] %v677_v59  }
 0x132   :  { %832 = shalt.err (!%p829_p0)
}
 0x133   :  { %587 = dma.vmem_to_hbm [thread:$0]  %s582_s3, 512, %s940_s4, [#allocation4], %s851_s25, %s851_s25, %s852_s26  }
 0x134   :  { %845 = dma.done.wait [#allocation4], 512  }
 0x135   :  { %846 = vsyncadd [#allocation4], 4294966784 }
 0x136   :  { %591 = vsyncpa [#allocation3], 1 }
 0x137   :  { %592 = vsyncpa [#allocation6], 1 }
 0x138   :  { %593 = vsyncpa [#allocation4], 1 }

</bundles_post_ra>
